<compile_context>
chip_gen: v7x
topology: tpu7x:2x2x1
jax: 0.10.0
libtpu: 0.0.40
codegen_flags: <defaults>
</compile_context>

<pallas_src>
import math
import numpy as np
import jax
import jax.numpy as jnp
from jax.experimental import pallas as pl
from jax.experimental.pallas import tpu as pltpu


def _build_layer_constants(w, b, H, W, pad):
    """Host-side: expand Conv2d weights into per-column-tap banded matmul matrices.

    M[dx, ci*H + h, co*Ho + y] = w[co, ci, h - y + pad, dx]  (0 where the tap falls
    outside the image -> height zero-padding folded in).  brow = bias per output column.
    """
    w = np.asarray(w, np.float32)
    b = np.asarray(b, np.float32)
    Cout, Cin, kh, kw = w.shape
    Ho = H + 2 * pad - kh + 1
    M = np.zeros((kw, Cin * H, Cout * Ho), np.float32)
    rows_base = np.arange(Cin) * H
    cols_base = np.arange(Cout) * Ho
    for dx in range(kw):
        for dy in range(kh):
            for y in range(Ho):
                h = y - pad + dy
                if 0 <= h < H:
                    M[dx][np.ix_(rows_base + h, cols_base + y)] = w[:, :, dy, dx].T
    brow = np.repeat(b, Ho)[None, :].astype(np.float32)
    return M, brow


def _build_pool_row_selectors(Wo, bb):
    """0/1 selectors picking even / odd output widths of a (Wo*bb, :) slab
    (rows ordered width-major, batch-minor).  Odd Wo truncates like max_pool2d."""
    Wout = Wo // 2
    sel_e = np.zeros((Wout * bb, Wo * bb), np.float32)
    sel_o = np.zeros((Wout * bb, Wo * bb), np.float32)
    for j in range(Wout):
        for bsub in range(bb):
            sel_e[j * bb + bsub, (2 * j) * bb + bsub] = 1.0
            sel_o[j * bb + bsub, (2 * j + 1) * bb + bsub] = 1.0
    return sel_e, sel_o


def _make_fused_cnn_kernel(layer_cfgs, pad, bb, pool_used, widths_const, out_dtype, cdt):
    """One fused kernel: all conv blocks + bias [+ last-layer 2x2 maxpool] + ELU
    [+ residual].  Activation layout: (W*bb, C*H) slab, width-major/batch-minor rows."""

    def kernel(*refs):
        x_ref = refs[0]
        pos = 1
        layer_refs = []
        for cfg in layer_cfgs:
            if cfg[7]:                              # pooled layer: (M_even, M_odd, bias)
                layer_refs.append(refs[pos:pos + 3]); pos += 3
            else:                                   # plain layer: (M, bias)
                layer_refs.append(refs[pos:pos + 2]); pos += 2
        if pool_used:
            sel_e_ref, sel_o_ref = refs[pos], refs[pos + 1]; pos += 2
        o_ref = refs[pos]; pos += 1
        pad_ref = refs[pos] if pad > 0 else None

        # Hoisted width-pad zeroing: pad rows are never touched by the interior writes,
        # so zero them once per grid step (outside the layer loop).
        if pad > 0:
            zrow = jnp.zeros((pad * bb, pad_ref.shape[1]), cdt)
            pad_ref[0:pad * bb, :] = zrow
            if widths_const:
                Wk = layer_cfgs[0][2]
                pad_ref[(pad + Wk) * bb:(2 * pad + Wk) * bb, :] = zrow

        act = x_ref[0].astype(jnp.float32)          # (W*bb, C*H) slab, f32 carry

        for li, (C, H, Wc, Cout, Ho, Wo, kw_l, do_pool, add_res) in enumerate(layer_cfgs):
            K = C * H
            if pad > 0:
                if not widths_const:                # shrinking widths: re-zero bottom pad
                    pad_ref[(pad + Wc) * bb:(2 * pad + Wc) * bb, 0:K] = \
                        jnp.zeros((pad * bb, K), cdt)
                pad_ref[pad * bb:(pad + Wc) * bb, 0:K] = act.astype(cdt)
                taps = [pad_ref[dx * bb:(dx + Wo) * bb, 0:K] for dx in range(kw_l)]
            else:
                act_c = act.astype(cdt)
                taps = [act_c[dx * bb:(dx + Wo) * bb, :] for dx in range(kw_l)]

            if do_pool:
                # Conv with even/odd output-height weight matrices; max = pool (height).
                me_ref, mo_ref, b_ref = layer_refs[li]
                ye = jnp.dot(taps[0], me_ref[0], preferred_element_type=jnp.float32)
                yo = jnp.dot(taps[0], mo_ref[0], preferred_element_type=jnp.float32)
                for dx in range(1, kw_l):
                    ye = ye + jnp.dot(taps[dx], me_ref[dx],
                                      preferred_element_type=jnp.float32)
                    yo = yo + jnp.dot(taps[dx], mo_ref[dx],
                                      preferred_element_type=jnp.float32)
                y = jnp.maximum(ye, yo)
                # Pool width direction: select widths 2i / 2i+1 (0/1 matmuls), then max.
                y = jnp.maximum(
                    jnp.dot(sel_e_ref[...], y, preferred_element_type=jnp.float32),
                    jnp.dot(sel_o_ref[...], y, preferred_element_type=jnp.float32))
                y = y + b_ref[...]                  # bias commutes with max (per channel)
            else:
                m_ref, b_ref = layer_refs[li]
                y = jnp.dot(taps[0], m_ref[0], preferred_element_type=jnp.float32)
                for dx in range(1, kw_l):
                    y = y + jnp.dot(taps[dx], m_ref[dx],
                                    preferred_element_type=jnp.float32)
                y = y + b_ref[...]

            # ELU (alpha=1).  exp(min(y,0))-1 keeps the guaranteed Mosaic lowering;
            # expm1 would be marginally more accurate near 0- (within test tolerance).
            y = jnp.where(y > 0.0, y, jnp.exp(jnp.minimum(y, 0.0)) - 1.0)

            if add_res:                             # residual = this layer's input
                y = y + act
            act = y

        o_ref[0] = act.astype(out_dtype)

    return kernel


def cnn_forward(x, params, *, kernel_size, pool=True, residual=True,
                batch_block=None, compute_dtype=jnp.float32):
    """Pallas implementation of CNN.forward: one fused pallas_call for the stack."""
    N, Cin, H, W = x.shape
    pad = 1 if kernel_size > 2 else 0
    n_layers = len(params)
    cdt = jnp.dtype(compute_dtype)

    # Batch packing: bb elements per grid step, stacked along the matmul row dimension.
    # (On a 2-TensorCore part with small N, pass batch_block=N//2 to feed both cores.)
    bb = int(batch_block) if batch_block is not None else max(1, min(N, 8))
    nblk = (N + bb - 1) // bb
    Np = nblk * bb
    if Np != N:
        x = jnp.concatenate([x, jnp.zeros((Np - N,) + x.shape[1:], x.dtype)], axis=0)

    layer_cfgs, const_inputs = [], []
    in_specs = [pl.BlockSpec((1, W * bb, Cin * H), lambda n: (n, 0, 0))]
    C, Hc, Wc = Cin, H, W
    for i, (w, b) in enumerate(params):
        Cout, _, kh, kw_l = w.shape
        Ho = Hc + 2 * pad - kh + 1
        Wo = Wc + 2 * pad - kw_l + 1
        do_pool = pool and (i == n_layers - 1) and (n_layers > 1)
        Hout, Wout = (Ho // 2, Wo // 2) if do_pool else (Ho, Wo)
        add_res = residual and (C, Hc, Wc) == (Cout, Hout, Wout)

        M, brow = _build_layer_constants(w, b, Hc, Wc, pad)
        if do_pool:
            idx_even = (np.arange(Cout)[:, None] * Ho
                        + 2 * np.arange(Hout)[None, :]).reshape(-1)
            M_even, M_odd = M[:, :, idx_even], M[:, :, idx_even + 1]
            b_fold = np.repeat(np.asarray(b, np.float32), Hout)[None, :]
            const_inputs += [jnp.asarray(M_even, dtype=cdt),
                             jnp.asarray(M_odd, dtype=cdt),
                             jnp.asarray(b_fold)]
            in_specs += [pl.BlockSpec(M_even.shape, lambda n: (0, 0, 0)),
                         pl.BlockSpec(M_odd.shape, lambda n: (0, 0, 0)),
                         pl.BlockSpec(b_fold.shape, lambda n: (0, 0))]
        else:
            const_inputs += [jnp.asarray(M, dtype=cdt), jnp.asarray(brow)]
            in_specs += [pl.BlockSpec(M.shape, lambda n: (0, 0, 0)),
                         pl.BlockSpec(brow.shape, lambda n: (0, 0))]

        layer_cfgs.append((C, Hc, Wc, Cout, Ho, Wo, kw_l, do_pool, add_res))
        C, Hc, Wc = Cout, Hout, Wout

    pool_used = any(cfg[7] for cfg in layer_cfgs)
    if pool_used:
        sel_e, sel_o = _build_pool_row_selectors(layer_cfgs[-1][5], bb)
        const_inputs += [jnp.asarray(sel_e), jnp.asarray(sel_o)]
        in_specs += [pl.BlockSpec(sel_e.shape, lambda n: (0, 0)),
                     pl.BlockSpec(sel_o.shape, lambda n: (0, 0))]

    # Input slab: (nblk, W*bb, Cin*H); row = w*bb + b_local, lane = ci*H + h.
    xt = (x.reshape(nblk, bb, Cin, H, W)
           .transpose(0, 4, 1, 2, 3)
           .reshape(nblk, W * bb, Cin * H))

    out_W, out_CH = Wc, C * Hc
    out_specs = pl.BlockSpec((1, out_W * bb, out_CH), lambda n: (n, 0, 0))
    out_shape = jax.ShapeDtypeStruct((nblk, out_W * bb, out_CH), x.dtype)

    scratch_shapes, widths_const = [], True
    if pad > 0:
        pad_widths = [cfg[2] for cfg in layer_cfgs]
        widths_const = len(set(pad_widths)) == 1
        maxW = max(pad_widths)
        maxK = max(cfg[0] * cfg[1] for cfg in layer_cfgs)
        scratch_shapes.append(pltpu.VMEM(((maxW + 2 * pad) * bb, maxK), cdt))

    kernel = _make_fused_cnn_kernel(tuple(layer_cfgs), pad, bb, pool_used,
                                    widths_const, x.dtype, cdt)
    out = pl.pallas_call(
        kernel,
        out_shape=out_shape,
        grid=(nblk,),
        in_specs=in_specs,
        out_specs=out_specs,
        scratch_shapes=scratch_shapes,
        compiler_params=pltpu.CompilerParams(
            dimension_semantics=("parallel",)),     # 2-TC parts split batch blocks
    )(xt, *const_inputs)

    # (nblk, W_f*bb, Cout*H_f) -> (N, Cout, H_f, W_f)  (wrapper-side layout plumbing).
    out = (out.reshape(nblk, out_W, bb, C, Hc)
              .transpose(0, 2, 3, 4, 1)
              .reshape(Np, C, Hc, out_W))
    return out[:N]


def cnn_reference(x, params, *, kernel_size, pool=True, residual=True):
    """Pure-JAX reference (mirrors the PyTorch module semantics)."""
    p = (1, 1) if kernel_size > 2 else (0, 0)
    n_layers = len(params)
    cur = x
    for i, (w, b) in enumerate(params):
        y = jax.lax.conv_general_dilated(
            cur, w, window_strides=(1, 1),
            padding=((p[0], p[0]), (p[1], p[1])),
            dimension_numbers=("NCHW", "OIHW", "NCHW"))
        y = y + b[None, :, None, None]
        if pool and i == n_layers - 1 and n_layers > 1:
            y = jax.lax.reduce_window(y, -jnp.inf, jax.lax.max,
                                      (1, 1, 2, 2), (1, 1, 2, 2), "VALID")
        y = jax.nn.elu(y)
        if residual and cur.shape == y.shape:
            y = y + cur
        cur = y
    return cur


def init_params(key, in_channels, out_channels, layers, kernel_size):
    params = []
    keys = jax.random.split(key, 2 * layers)
    for i in range(layers):
        cin_i = in_channels if i == 0 else out_channels
        fan_in = cin_i * kernel_size * kernel_size
        w = jax.random.normal(keys[2 * i],
                              (out_channels, cin_i, kernel_size, kernel_size),
                              jnp.float32) * (1.0 / math.sqrt(fan_in))
        b = jax.random.normal(keys[2 * i + 1], (out_channels,), jnp.float32) * 0.05
        params.append((w, b))
    return params


if __name__ == "__main__":
    N, Cin, H, W = 2, 4, 16, 16
    Cout, layers = 8, 4

    key = jax.random.PRNGKey(0)
    kx, kp2, kp3 = jax.random.split(key, 3)
    x = jax.random.normal(kx, (N, Cin, H, W), jnp.float32)

    # kernel_size=2 is the module default (no residual ever matches, pool on last layer);
    # kernel_size=3 exercises padding=(1,1), the residual-add path and the pad scratch.
    for ks, kparam in ((2, kp2), (3, kp3)):
        params = init_params(kparam, Cin, Cout, layers, ks)
        out = jax.block_until_ready(
            cnn_forward(x, params, kernel_size=ks, pool=True, residual=True))
        ref = jax.block_until_ready(
            cnn_reference(x, params, kernel_size=ks, pool=True, residual=True))
        assert out.shape == ref.shape, (out.shape, ref.shape)
        assert np.allclose(np.asarray(out), np.asarray(ref), rtol=1e-3, atol=1e-3), \
            f"mismatch for kernel_size={ks}"

    # bf16 MXU-operand variant (f32 accumulation) — looser tolerance for the bf16 path.
    params3 = init_params(kp3, Cin, Cout, layers, 3)
    out_bf = jax.block_until_ready(
        cnn_forward(x, params3, kernel_size=3, pool=True, residual=True,
                    compute_dtype=jnp.bfloat16))
    ref3 = np.asarray(cnn_reference(x, params3, kernel_size=3, pool=True, residual=True))
    assert np.allclose(np.asarray(out_bf), ref3, rtol=7e-2, atol=7e-2), "bf16 mismatch"

    print("KERNEL_OK")
</pallas_src>

<mosaic_0001>
module attributes {stable_mosaic.version = 11 : i64} {
  func.func @kernel(%arg0: i32, %arg1: memref<1x32x64xf32, #tpu.memory_space<vmem>>, %arg2: memref<2x64x120xf32, #tpu.memory_space<vmem>>, %arg3: memref<1x120xf32, #tpu.memory_space<vmem>>, %arg4: memref<2x120x112xf32, #tpu.memory_space<vmem>>, %arg5: memref<1x112xf32, #tpu.memory_space<vmem>>, %arg6: memref<2x112x104xf32, #tpu.memory_space<vmem>>, %arg7: memref<1x104xf32, #tpu.memory_space<vmem>>, %arg8: memref<2x104x48xf32, #tpu.memory_space<vmem>>, %arg9: memref<2x104x48xf32, #tpu.memory_space<vmem>>, %arg10: memref<1x48xf32, #tpu.memory_space<vmem>>, %arg11: memref<12x24xf32, #tpu.memory_space<vmem>>, %arg12: memref<12x24xf32, #tpu.memory_space<vmem>>, %arg13: memref<1x12x48xf32, #tpu.memory_space<vmem>>) attributes {dimension_semantics = [#tpu.dimension_semantics<parallel>], iteration_bounds = array<i64: 1>, scalar_prefetch = 0 : i64, scratch_operands = 0 : i64, tpu.core_type = #tpu.core_type<tc>, window_params = [{transform_indices = @transform_0, window_bounds = array<i64: 1, 32, 64>}, {pipeline_mode = #tpu.pipeline_mode<synchronous>, transform_indices = @transform_1, window_bounds = array<i64: 2, 64, 120>}, {pipeline_mode = #tpu.pipeline_mode<synchronous>, transform_indices = @transform_2, window_bounds = array<i64: 1, 120>}, {pipeline_mode = #tpu.pipeline_mode<synchronous>, transform_indices = @transform_3, window_bounds = array<i64: 2, 120, 112>}, {pipeline_mode = #tpu.pipeline_mode<synchronous>, transform_indices = @transform_4, window_bounds = array<i64: 1, 112>}, {pipeline_mode = #tpu.pipeline_mode<synchronous>, transform_indices = @transform_5, window_bounds = array<i64: 2, 112, 104>}, {pipeline_mode = #tpu.pipeline_mode<synchronous>, transform_indices = @transform_6, window_bounds = array<i64: 1, 104>}, {pipeline_mode = #tpu.pipeline_mode<synchronous>, transform_indices = @transform_7, window_bounds = array<i64: 2, 104, 48>}, {pipeline_mode = #tpu.pipeline_mode<synchronous>, transform_indices = @transform_8, window_bounds = array<i64: 2, 104, 48>}, {pipeline_mode = #tpu.pipeline_mode<synchronous>, transform_indices = @transform_9, window_bounds = array<i64: 1, 48>}, {pipeline_mode = #tpu.pipeline_mode<synchronous>, transform_indices = @transform_10, window_bounds = array<i64: 12, 24>}, {pipeline_mode = #tpu.pipeline_mode<synchronous>, transform_indices = @transform_11, window_bounds = array<i64: 12, 24>}, {transform_indices = @transform_12, window_bounds = array<i64: 1, 12, 48>}]} {
    %c0 = arith.constant 0 : index
    %c0_0 = arith.constant 0 : index
    %c0_1 = arith.constant 0 : index
    %0 = vector.load %arg1[%c0, %c0_0, %c0_1] : memref<1x32x64xf32, #tpu.memory_space<vmem>>, vector<1x32x64xf32>
    %1 = vector.shape_cast %0 : vector<1x32x64xf32> to vector<32x64xf32>
    %2 = vector.extract_strided_slice %1 {offsets = [0, 0], sizes = [30, 64], strides = [1, 1]} : vector<32x64xf32> to vector<30x64xf32>
    %3 = vector.extract_strided_slice %1 {offsets = [2, 0], sizes = [30, 64], strides = [1, 1]} : vector<32x64xf32> to vector<30x64xf32>
    %c0_2 = arith.constant 0 : index
    %c0_3 = arith.constant 0 : index
    %c0_4 = arith.constant 0 : index
    %4 = vector.load %arg2[%c0_2, %c0_3, %c0_4] : memref<2x64x120xf32, #tpu.memory_space<vmem>>, vector<1x64x120xf32>
    %5 = vector.shape_cast %4 : vector<1x64x120xf32> to vector<64x120xf32>
    %cst = arith.constant dense<0.000000e+00> : vector<30x120xf32>
    %6 = tpu.matmul %2, %5, %cst {dimension_numbers = #tpu.dot_dimension_numbers<[1], [0], [0], [1], [0, 0, 1, 1], [], []>} : vector<30x64xf32>, vector<64x120xf32>, vector<30x120xf32> -> vector<30x120xf32>
    %c1 = arith.constant 1 : index
    %c0_5 = arith.constant 0 : index
    %c0_6 = arith.constant 0 : index
    %7 = vector.load %arg2[%c1, %c0_5, %c0_6] : memref<2x64x120xf32, #tpu.memory_space<vmem>>, vector<1x64x120xf32>
    %8 = vector.shape_cast %7 : vector<1x64x120xf32> to vector<64x120xf32>
    %cst_7 = arith.constant dense<0.000000e+00> : vector<30x120xf32>
    %9 = tpu.matmul %3, %8, %cst_7 {dimension_numbers = #tpu.dot_dimension_numbers<[1], [0], [0], [1], [0, 0, 1, 1], [], []>} : vector<30x64xf32>, vector<64x120xf32>, vector<30x120xf32> -> vector<30x120xf32>
    %10 = arith.addf %6, %9 : vector<30x120xf32>
    %c0_8 = arith.constant 0 : index
    %c0_9 = arith.constant 0 : index
    %11 = vector.load %arg3[%c0_8, %c0_9] : memref<1x120xf32, #tpu.memory_space<vmem>>, vector<1x120xf32>
    %12 = vector.broadcast %11 : vector<1x120xf32> to vector<30x120xf32>
    %13 = arith.addf %10, %12 : vector<30x120xf32>
    %cst_10 = arith.constant 0.000000e+00 : f32
    %14 = vector.broadcast %cst_10 : f32 to vector<30x120xf32>
    %15 = arith.cmpf ogt, %13, %14 : vector<30x120xf32>
    %cst_11 = arith.constant 0.000000e+00 : f32
    %16 = vector.broadcast %cst_11 : f32 to vector<30x120xf32>
    %17 = arith.minimumf %13, %16 : vector<30x120xf32>
    %18 = math.exp %17 : vector<30x120xf32>
    %cst_12 = arith.constant 1.000000e+00 : f32
    %19 = vector.broadcast %cst_12 : f32 to vector<30x120xf32>
    %20 = arith.subf %18, %19 : vector<30x120xf32>
    %21 = arith.select %15, %13, %20 : vector<30x120xi1>, vector<30x120xf32>
    %22 = vector.extract_strided_slice %21 {offsets = [0, 0], sizes = [28, 120], strides = [1, 1]} : vector<30x120xf32> to vector<28x120xf32>
    %23 = vector.extract_strided_slice %21 {offsets = [2, 0], sizes = [28, 120], strides = [1, 1]} : vector<30x120xf32> to vector<28x120xf32>
    %c0_13 = arith.constant 0 : index
    %c0_14 = arith.constant 0 : index
    %c0_15 = arith.constant 0 : index
    %24 = vector.load %arg4[%c0_13, %c0_14, %c0_15] : memref<2x120x112xf32, #tpu.memory_space<vmem>>, vector<1x120x112xf32>
    %25 = vector.shape_cast %24 : vector<1x120x112xf32> to vector<120x112xf32>
    %cst_16 = arith.constant dense<0.000000e+00> : vector<28x112xf32>
    %26 = tpu.matmul %22, %25, %cst_16 {dimension_numbers = #tpu.dot_dimension_numbers<[1], [0], [0], [1], [0, 0, 1, 1], [], []>} : vector<28x120xf32>, vector<120x112xf32>, vector<28x112xf32> -> vector<28x112xf32>
    %c1_17 = arith.constant 1 : index
    %c0_18 = arith.constant 0 : index
    %c0_19 = arith.constant 0 : index
    %27 = vector.load %arg4[%c1_17, %c0_18, %c0_19] : memref<2x120x112xf32, #tpu.memory_space<vmem>>, vector<1x120x112xf32>
    %28 = vector.shape_cast %27 : vector<1x120x112xf32> to vector<120x112xf32>
    %cst_20 = arith.constant dense<0.000000e+00> : vector<28x112xf32>
    %29 = tpu.matmul %23, %28, %cst_20 {dimension_numbers = #tpu.dot_dimension_numbers<[1], [0], [0], [1], [0, 0, 1, 1], [], []>} : vector<28x120xf32>, vector<120x112xf32>, vector<28x112xf32> -> vector<28x112xf32>
    %30 = arith.addf %26, %29 : vector<28x112xf32>
    %c0_21 = arith.constant 0 : index
    %c0_22 = arith.constant 0 : index
    %31 = vector.load %arg5[%c0_21, %c0_22] : memref<1x112xf32, #tpu.memory_space<vmem>>, vector<1x112xf32>
    %32 = vector.broadcast %31 : vector<1x112xf32> to vector<28x112xf32>
    %33 = arith.addf %30, %32 : vector<28x112xf32>
    %cst_23 = arith.constant 0.000000e+00 : f32
    %34 = vector.broadcast %cst_23 : f32 to vector<28x112xf32>
    %35 = arith.cmpf ogt, %33, %34 : vector<28x112xf32>
    %cst_24 = arith.constant 0.000000e+00 : f32
    %36 = vector.broadcast %cst_24 : f32 to vector<28x112xf32>
    %37 = arith.minimumf %33, %36 : vector<28x112xf32>
    %38 = math.exp %37 : vector<28x112xf32>
    %cst_25 = arith.constant 1.000000e+00 : f32
    %39 = vector.broadcast %cst_25 : f32 to vector<28x112xf32>
    %40 = arith.subf %38, %39 : vector<28x112xf32>
    %41 = arith.select %35, %33, %40 : vector<28x112xi1>, vector<28x112xf32>
    %42 = vector.extract_strided_slice %41 {offsets = [0, 0], sizes = [26, 112], strides = [1, 1]} : vector<28x112xf32> to vector<26x112xf32>
    %43 = vector.extract_strided_slice %41 {offsets = [2, 0], sizes = [26, 112], strides = [1, 1]} : vector<28x112xf32> to vector<26x112xf32>
    %c0_26 = arith.constant 0 : index
    %c0_27 = arith.constant 0 : index
    %c0_28 = arith.constant 0 : index
    %44 = vector.load %arg6[%c0_26, %c0_27, %c0_28] : memref<2x112x104xf32, #tpu.memory_space<vmem>>, vector<1x112x104xf32>
    %45 = vector.shape_cast %44 : vector<1x112x104xf32> to vector<112x104xf32>
    %cst_29 = arith.constant dense<0.000000e+00> : vector<26x104xf32>
    %46 = tpu.matmul %42, %45, %cst_29 {dimension_numbers = #tpu.dot_dimension_numbers<[1], [0], [0], [1], [0, 0, 1, 1], [], []>} : vector<26x112xf32>, vector<112x104xf32>, vector<26x104xf32> -> vector<26x104xf32>
    %c1_30 = arith.constant 1 : index
    %c0_31 = arith.constant 0 : index
    %c0_32 = arith.constant 0 : index
    %47 = vector.load %arg6[%c1_30, %c0_31, %c0_32] : memref<2x112x104xf32, #tpu.memory_space<vmem>>, vector<1x112x104xf32>
    %48 = vector.shape_cast %47 : vector<1x112x104xf32> to vector<112x104xf32>
    %cst_33 = arith.constant dense<0.000000e+00> : vector<26x104xf32>
    %49 = tpu.matmul %43, %48, %cst_33 {dimension_numbers = #tpu.dot_dimension_numbers<[1], [0], [0], [1], [0, 0, 1, 1], [], []>} : vector<26x112xf32>, vector<112x104xf32>, vector<26x104xf32> -> vector<26x104xf32>
    %50 = arith.addf %46, %49 : vector<26x104xf32>
    %c0_34 = arith.constant 0 : index
    %c0_35 = arith.constant 0 : index
    %51 = vector.load %arg7[%c0_34, %c0_35] : memref<1x104xf32, #tpu.memory_space<vmem>>, vector<1x104xf32>
    %52 = vector.broadcast %51 : vector<1x104xf32> to vector<26x104xf32>
    %53 = arith.addf %50, %52 : vector<26x104xf32>
    %cst_36 = arith.constant 0.000000e+00 : f32
    %54 = vector.broadcast %cst_36 : f32 to vector<26x104xf32>
    %55 = arith.cmpf ogt, %53, %54 : vector<26x104xf32>
    %cst_37 = arith.constant 0.000000e+00 : f32
    %56 = vector.broadcast %cst_37 : f32 to vector<26x104xf32>
    %57 = arith.minimumf %53, %56 : vector<26x104xf32>
    %58 = math.exp %57 : vector<26x104xf32>
    %cst_38 = arith.constant 1.000000e+00 : f32
    %59 = vector.broadcast %cst_38 : f32 to vector<26x104xf32>
    %60 = arith.subf %58, %59 : vector<26x104xf32>
    %61 = arith.select %55, %53, %60 : vector<26x104xi1>, vector<26x104xf32>
    %62 = vector.extract_strided_slice %61 {offsets = [0, 0], sizes = [24, 104], strides = [1, 1]} : vector<26x104xf32> to vector<24x104xf32>
    %63 = vector.extract_strided_slice %61 {offsets = [2, 0], sizes = [24, 104], strides = [1, 1]} : vector<26x104xf32> to vector<24x104xf32>
    %c0_39 = arith.constant 0 : index
    %c0_40 = arith.constant 0 : index
    %c0_41 = arith.constant 0 : index
    %64 = vector.load %arg8[%c0_39, %c0_40, %c0_41] : memref<2x104x48xf32, #tpu.memory_space<vmem>>, vector<1x104x48xf32>
    %65 = vector.shape_cast %64 : vector<1x104x48xf32> to vector<104x48xf32>
    %cst_42 = arith.constant dense<0.000000e+00> : vector<24x48xf32>
    %66 = tpu.matmul %62, %65, %cst_42 {dimension_numbers = #tpu.dot_dimension_numbers<[1], [0], [0], [1], [0, 0, 1, 1], [], []>} : vector<24x104xf32>, vector<104x48xf32>, vector<24x48xf32> -> vector<24x48xf32>
    %c0_43 = arith.constant 0 : index
    %c0_44 = arith.constant 0 : index
    %c0_45 = arith.constant 0 : index
    %67 = vector.load %arg9[%c0_43, %c0_44, %c0_45] : memref<2x104x48xf32, #tpu.memory_space<vmem>>, vector<1x104x48xf32>
    %68 = vector.shape_cast %67 : vector<1x104x48xf32> to vector<104x48xf32>
    %cst_46 = arith.constant dense<0.000000e+00> : vector<24x48xf32>
    %69 = tpu.matmul %62, %68, %cst_46 {dimension_numbers = #tpu.dot_dimension_numbers<[1], [0], [0], [1], [0, 0, 1, 1], [], []>} : vector<24x104xf32>, vector<104x48xf32>, vector<24x48xf32> -> vector<24x48xf32>
    %c1_47 = arith.constant 1 : index
    %c0_48 = arith.constant 0 : index
    %c0_49 = arith.constant 0 : index
    %70 = vector.load %arg8[%c1_47, %c0_48, %c0_49] : memref<2x104x48xf32, #tpu.memory_space<vmem>>, vector<1x104x48xf32>
    %71 = vector.shape_cast %70 : vector<1x104x48xf32> to vector<104x48xf32>
    %cst_50 = arith.constant dense<0.000000e+00> : vector<24x48xf32>
    %72 = tpu.matmul %63, %71, %cst_50 {dimension_numbers = #tpu.dot_dimension_numbers<[1], [0], [0], [1], [0, 0, 1, 1], [], []>} : vector<24x104xf32>, vector<104x48xf32>, vector<24x48xf32> -> vector<24x48xf32>
    %73 = arith.addf %66, %72 : vector<24x48xf32>
    %c1_51 = arith.constant 1 : index
    %c0_52 = arith.constant 0 : index
    %c0_53 = arith.constant 0 : index
    %74 = vector.load %arg9[%c1_51, %c0_52, %c0_53] : memref<2x104x48xf32, #tpu.memory_space<vmem>>, vector<1x104x48xf32>
    %75 = vector.shape_cast %74 : vector<1x104x48xf32> to vector<104x48xf32>
    %cst_54 = arith.constant dense<0.000000e+00> : vector<24x48xf32>
    %76 = tpu.matmul %63, %75, %cst_54 {dimension_numbers = #tpu.dot_dimension_numbers<[1], [0], [0], [1], [0, 0, 1, 1], [], []>} : vector<24x104xf32>, vector<104x48xf32>, vector<24x48xf32> -> vector<24x48xf32>
    %77 = arith.addf %69, %76 : vector<24x48xf32>
    %78 = arith.maximumf %73, %77 : vector<24x48xf32>
    %c0_55 = arith.constant 0 : index
    %c0_56 = arith.constant 0 : index
    %79 = vector.load %arg11[%c0_55, %c0_56] : memref<12x24xf32, #tpu.memory_space<vmem>>, vector<12x24xf32>
    %cst_57 = arith.constant dense<0.000000e+00> : vector<12x48xf32>
    %80 = tpu.matmul %79, %78, %cst_57 {dimension_numbers = #tpu.dot_dimension_numbers<[1], [0], [0], [1], [0, 0, 1, 1], [], []>} : vector<12x24xf32>, vector<24x48xf32>, vector<12x48xf32> -> vector<12x48xf32>
    %c0_58 = arith.constant 0 : index
    %c0_59 = arith.constant 0 : index
    %81 = vector.load %arg12[%c0_58, %c0_59] : memref<12x24xf32, #tpu.memory_space<vmem>>, vector<12x24xf32>
    %cst_60 = arith.constant dense<0.000000e+00> : vector<12x48xf32>
    %82 = tpu.matmul %81, %78, %cst_60 {dimension_numbers = #tpu.dot_dimension_numbers<[1], [0], [0], [1], [0, 0, 1, 1], [], []>} : vector<12x24xf32>, vector<24x48xf32>, vector<12x48xf32> -> vector<12x48xf32>
    %83 = arith.maximumf %80, %82 : vector<12x48xf32>
    %c0_61 = arith.constant 0 : index
    %c0_62 = arith.constant 0 : index
    %84 = vector.load %arg10[%c0_61, %c0_62] : memref<1x48xf32, #tpu.memory_space<vmem>>, vector<1x48xf32>
    %85 = vector.broadcast %84 : vector<1x48xf32> to vector<12x48xf32>
    %86 = arith.addf %83, %85 : vector<12x48xf32>
    %cst_63 = arith.constant 0.000000e+00 : f32
    %87 = vector.broadcast %cst_63 : f32 to vector<12x48xf32>
    %88 = arith.cmpf ogt, %86, %87 : vector<12x48xf32>
    %cst_64 = arith.constant 0.000000e+00 : f32
    %89 = vector.broadcast %cst_64 : f32 to vector<12x48xf32>
    %90 = arith.minimumf %86, %89 : vector<12x48xf32>
    %91 = math.exp %90 : vector<12x48xf32>
    %cst_65 = arith.constant 1.000000e+00 : f32
    %92 = vector.broadcast %cst_65 : f32 to vector<12x48xf32>
    %93 = arith.subf %91, %92 : vector<12x48xf32>
    %94 = arith.select %88, %86, %93 : vector<12x48xi1>, vector<12x48xf32>
    %c0_66 = arith.constant 0 : index
    %c0_67 = arith.constant 0 : index
    %c0_68 = arith.constant 0 : index
    %95 = vector.load %arg13[%c0_66, %c0_67, %c0_68] : memref<1x12x48xf32, #tpu.memory_space<vmem>>, vector<1x12x48xf32>
    %96 = vector.shape_cast %95 : vector<1x12x48xf32> to vector<12x48xf32>
    %97 = vector.shape_cast %94 : vector<12x48xf32> to vector<1x12x48xf32>
    tpu.vector_store %arg13[%c0_66, %c0_67, %c0_68], %97 {strides = array<i32>} : memref<1x12x48xf32, #tpu.memory_space<vmem>>, vector<1x12x48xf32>,
    return
  }
  func.func @transform_0(%arg0: i32) -> (i32, i32, i32) {
    %c0_i32 = arith.constant 0 : i32
    %c0_i32_0 = arith.constant 0 : i32
    %c0_i32_1 = arith.constant 0 : i32
    return %arg0, %c0_i32, %c0_i32_0 : i32, i32, i32
  }
  func.func @transform_1(%arg0: i32) -> (i32, i32, i32) {
    %c0_i32 = arith.constant 0 : i32
    %c0_i32_0 = arith.constant 0 : i32
    %c0_i32_1 = arith.constant 0 : i32
    %c0_i32_2 = arith.constant 0 : i32
    return %c0_i32, %c0_i32_0, %c0_i32_1 : i32, i32, i32
  }
  func.func @transform_2(%arg0: i32) -> (i32, i32) {
    %c0_i32 = arith.constant 0 : i32
    %c0_i32_0 = arith.constant 0 : i32
    %c0_i32_1 = arith.constant 0 : i32
    return %c0_i32, %c0_i32_0 : i32, i32
  }
  func.func @transform_3(%arg0: i32) -> (i32, i32, i32) {
    %c0_i32 = arith.constant 0 : i32
    %c0_i32_0 = arith.constant 0 : i32
    %c0_i32_1 = arith.constant 0 : i32
    %c0_i32_2 = arith.constant 0 : i32
    return %c0_i32, %c0_i32_0, %c0_i32_1 : i32, i32, i32
  }
  func.func @transform_4(%arg0: i32) -> (i32, i32) {
    %c0_i32 = arith.constant 0 : i32
    %c0_i32_0 = arith.constant 0 : i32
    %c0_i32_1 = arith.constant 0 : i32
    return %c0_i32, %c0_i32_0 : i32, i32
  }
  func.func @transform_5(%arg0: i32) -> (i32, i32, i32) {
    %c0_i32 = arith.constant 0 : i32
    %c0_i32_0 = arith.constant 0 : i32
    %c0_i32_1 = arith.constant 0 : i32
    %c0_i32_2 = arith.constant 0 : i32
    return %c0_i32, %c0_i32_0, %c0_i32_1 : i32, i32, i32
  }
  func.func @transform_6(%arg0: i32) -> (i32, i32) {
    %c0_i32 = arith.constant 0 : i32
    %c0_i32_0 = arith.constant 0 : i32
    %c0_i32_1 = arith.constant 0 : i32
    return %c0_i32, %c0_i32_0 : i32, i32
  }
  func.func @transform_7(%arg0: i32) -> (i32, i32, i32) {
    %c0_i32 = arith.constant 0 : i32
    %c0_i32_0 = arith.constant 0 : i32
    %c0_i32_1 = arith.constant 0 : i32
    %c0_i32_2 = arith.constant 0 : i32
    return %c0_i32, %c0_i32_0, %c0_i32_1 : i32, i32, i32
  }
  func.func @transform_8(%arg0: i32) -> (i32, i32, i32) {
    %c0_i32 = arith.constant 0 : i32
    %c0_i32_0 = arith.constant 0 : i32
    %c0_i32_1 = arith.constant 0 : i32
    %c0_i32_2 = arith.constant 0 : i32
    return %c0_i32, %c0_i32_0, %c0_i32_1 : i32, i32, i32
  }
  func.func @transform_9(%arg0: i32) -> (i32, i32) {
    %c0_i32 = arith.constant 0 : i32
    %c0_i32_0 = arith.constant 0 : i32
    %c0_i32_1 = arith.constant 0 : i32
    return %c0_i32, %c0_i32_0 : i32, i32
  }
  func.func @transform_10(%arg0: i32) -> (i32, i32) {
    %c0_i32 = arith.constant 0 : i32
    %c0_i32_0 = arith.constant 0 : i32
    %c0_i32_1 = arith.constant 0 : i32
    return %c0_i32, %c0_i32_0 : i32, i32
  }
  func.func @transform_11(%arg0: i32) -> (i32, i32) {
    %c0_i32 = arith.constant 0 : i32
    %c0_i32_0 = arith.constant 0 : i32
    %c0_i32_1 = arith.constant 0 : i32
    return %c0_i32, %c0_i32_0 : i32, i32
  }
  func.func @transform_12(%arg0: i32) -> (i32, i32, i32) {
    %c0_i32 = arith.constant 0 : i32
    %c0_i32_0 = arith.constant 0 : i32
    %c0_i32_1 = arith.constant 0 : i32
    return %arg0, %c0_i32, %c0_i32_0 : i32, i32, i32
  }
}

</mosaic_0001>

<bundles_post_ra>
// kernel: tpu_custom_call.1
= control target key start
LH: loop header
LB: loop body
LE: loop exit
PB: predicated region body
PF: predicated region fallthrough
CT: control target
= control target key end

     0   :  { %vm74_vm0 = vcmask 523264   ;;  %vm66_vm1 = vcmask 1045504   ;;  %vm338_vm4 = vcmask 982016   ;;  %vm600_vm9 = vcmask 916480   ;;  %s2950_s1 = inlined_call_operand.vmem [shape: f32[2,64,120], index: 1, kind: input, shape index: {}]   ;;  %s2951_s0 = inlined_call_operand.vmem [shape: f32[1,32,64], index: 0, kind: input, shape index: {}]   ;;  %s2952_s3 = inlined_call_operand.vmem [shape: f32[2,120,112], index: 3, kind: input, shape index: {}]   ;;  %s2953_s2 = inlined_call_operand.vmem [shape: f32[1,120], index: 2, kind: input, shape index: {}]   ;;  %s2954_s5 = inlined_call_operand.vmem [shape: f32[2,112,104], index: 5, kind: input, shape index: {}]   ;;  %s2955_s7 = inlined_call_operand.vmem [shape: f32[2,104,48], index: 7, kind: input, shape index: {}]   ;;  %s2956_s4 = inlined_call_operand.vmem [shape: f32[1,112], index: 4, kind: input, shape index: {}]   ;;  %s2957_s8 = inlined_call_operand.vmem [shape: f32[2,104,48], index: 8, kind: input, shape index: {}]   ;;  %s2958_s6 = inlined_call_operand.vmem [shape: f32[1,104], index: 6, kind: input, shape index: {}]   ;;  %s2959_s10 = inlined_call_operand.vmem [shape: f32[12,24], index: 10, kind: input, shape index: {}]   ;;  %s2960_s11 = inlined_call_operand.vmem [shape: f32[12,24], index: 11, kind: input, shape index: {}]   ;;  %s2961_s9 = inlined_call_operand.vmem [shape: f32[1,48], index: 9, kind: input, shape index: {}]   ;;  %s2962_s12 = inlined_call_operand.vmem [shape: f32[1,12,48], index: 12, kind: output, shape index: {}]  }
   0x1   :  { %v1421_v0 = vld [vmem:[%s2950_s1 + $0x40] sm:$0xff]  ;;  %v1422_v1 = vld [vmem:[%s2950_s1 + $0x48] sm:$0xff]  ;;  %v1423_v5 = vld [vmem:[%s2950_s1 + $0x50] sm:$0xff]  ;;  %vm2337_vm12 = vmmov 0   ;;  %vm873_vm15 = vcmask 850944  }
   0x2   :  { %v45_v2 = vld [vmem:[%s2950_s1] sm:$0xff]  ;;  %v2056_v3 = vpack.c.bf16 %v1422_v1, %v1421_v0  ;;  %v46_v4 = vld [vmem:[%s2950_s1 + $0x8] sm:$0xff]  ;;  %v1424_v6 = vld [vmem:[%s2950_s1 + $0x58] sm:$0xff] }
   0x3   :  { %v2072_v7 = vpack.c.bf16 %v46_v4, %v45_v2  ;;  %v2060_v8 = vpack.c.bf16 %v1424_v6, %v1423_v5  ;;  %v47_v9 = vld [vmem:[%s2950_s1 + $0x10] sm:$0xff]  ;;  %v48_v10 = vld [vmem:[%s2950_s1 + $0x18] sm:$0xff]  ;;  %v1425_v11 = vld [vmem:[%s2950_s1 + $0x60] sm:$0xff] }
   0x4   :  { %2057 = vmatprep.subr.bf16.mxu1 %v2056_v3  ;;  %v2076_v12 = vpack.c.bf16 %v48_v10, %v47_v9  ;;  %v1426_v13 = vld [vmem:[%s2950_s1 + $0x68] sm:$0xff]  ;;  %v49_v14 = vld [vmem:[%s2950_s1 + $0x20] sm:$0xff]  ;;  %v1427_v20 = vld [vmem:[%s2950_s1 + $0x70] sm:$0xff] }
   0x5   :  { %v50_v15 = vld [vmem:[%s2950_s1 + $0x28] sm:$0xff]  ;;  %2073 = vmatprep.subr.bf16.mxu0 %v2072_v7  ;;  %2059 = vmatpush3.bf16.msra.mxu1 %v2056_v3  ;;  %v2064_v16 = vpack.c.bf16 %v1426_v13, %v1425_v11  ;;  %v41_v17 = vld [vmem:[%s2951_s0] sm:$0xff]  ;;  %v1428_v21 = vld [vmem:[%s2950_s1 + $0x78] sm:$0xff] }
   0x6   :  { %2075 = vmatpush3.bf16.msra.mxu0 %v2072_v7  ;;  %2061 = vmatprep.subr.bf16.mxu1 %v2060_v8  ;;  %v42_v18 = vld [vmem:[%s2951_s0 + $0x8] sm:$0xff]  ;;  %v2080_v19 = vpack.c.bf16 %v50_v15, %v49_v14  ;;  %v67_v22 = vrot.slane %v41_v17, 2  ;;  %v51_v24 = vld [vmem:[%s2950_s1 + $0x30] sm:$0xff]  ;;  %v52_v25 = vld [vmem:[%s2950_s1 + $0x38] sm:$0xff]  ;;  %v2068_v27 = vpack.c.bf16 %v1428_v21, %v1427_v20 }
   0x7   :  { %2077 = vmatprep.subr.bf16.mxu0 %v2076_v12  ;;  %v68_v23 = vrot.slane %v42_v18, 2  ;;  %1752 = vmatprep.mubr.msk.f32.mxu0 %vm74_vm0, %v41_v17  ;;  %v43_v28 = vld [vmem:[%s2951_s0 + $0x10] sm:$0xff]  ;;  %v2084_v29 = vpack.c.bf16 %v52_v25, %v51_v24  ;;  %v44_v30 = vld [vmem:[%s2951_s0 + $0x18] sm:$0xff]  ;;  %v1443_v36 = vld [vmem:[%s2952_s3 + $0x80] sm:$0xff] }
   0x8   :  { %v70_v31 = vrot.slane %v43_v28, 2  ;;  %v72_v32 = vrot.slane %v44_v30, 2  ;;  %v1442_v35 = vld [vmem:[%s2952_s3 + $0x78] sm:$0xff]  ;;  %v1444_v38 = vld [vmem:[%s2952_s3 + $0x88] sm:$0xff]  ;;  %v1445_v39 = vld [vmem:[%s2952_s3 + $0x90] sm:$0xff] }
   0x9   :  { %2063 = vmatpush3.bf16.msra.mxu1 %v2060_v8  ;;  %v69_v26 = vsel %vm66_vm1, %v67_v22, %v68_v23  ;;  %v2088_v37 = vpack.c.bf16 %v1443_v36, %v1442_v35  ;;  %v2092_v40 = vpack.c.bf16 %v1445_v39, %v1444_v38  ;;  %v1446_v41 = vld [vmem:[%s2952_s3 + $0x98] sm:$0xff]  ;;  %v1447_v42 = vld [vmem:[%s2952_s3 + $0xa0] sm:$0xff]  ;;  %v1448_v44 = vld [vmem:[%s2952_s3 + $0xa8] sm:$0xff] }
   0xa   :  { %2079 = vmatpush3.bf16.msra.mxu0 %v2076_v12  ;;  %2065 = vmatprep.subr.bf16.mxu1 %v2064_v16  ;;  %v71_v33 = vsel %vm66_vm1, %v68_v23, %v70_v31  ;;  %v73_v34 = vsel %vm66_vm1, %v70_v31, %v72_v32  ;;  %v2096_v43 = vpack.c.bf16 %v1447_v42, %v1446_v41  ;;  %v1449_v45 = vld [vmem:[%s2952_s3 + $0xb0] sm:$0xff]  ;;  %v1450_v47 = vld [vmem:[%s2952_s3 + $0xb8] sm:$0xff]  ;;  %v1451_v48 = vld [vmem:[%s2952_s3 + $0xc0] sm:$0xff] }
   0xb   :  { %2081 = vmatprep.subr.bf16.mxu0 %v2080_v19  ;;  %1730 = vmatprep.mubr.msk.f32.mxu1 %vm74_vm0, %v69_v26  ;;  %v2100_v46 = vpack.c.bf16 %v1449_v45, %v1448_v44  ;;  %v2104_v49 = vpack.c.bf16 %v1451_v48, %v1450_v47  ;;  %v1452_v50 = vld [vmem:[%s2952_s3 + $0xc8] sm:$0xff]  ;;  %v1453_v51 = vld [vmem:[%s2952_s3 + $0xd0] sm:$0xff]  ;;  %v1454_v53 = vld [vmem:[%s2952_s3 + $0xd8] sm:$0xff] }
   0xc   :  { %v2108_v52 = vpack.c.bf16 %v1453_v51, %v1452_v50  ;;  %v1455_v54 = vld [vmem:[%s2952_s3 + $0xe0] sm:$0xff]  ;;  %v1456_v56 = vld [vmem:[%s2952_s3 + $0xe8] sm:$0xff]  ;;  %v298_v35 = vld [vmem:[%s2952_s3 + $0x10] sm:$0xff] }
   0xd   :  { %2067 = vmatpush3.bf16.msra.mxu1 %v2064_v16  ;;  %v2112_v55 = vpack.c.bf16 %v1455_v54, %v1454_v53  ;;  %v296_v57 = vld [vmem:[%s2952_s3] sm:$0xff]  ;;  %v297_v58 = vld [vmem:[%s2952_s3 + $0x8] sm:$0xff]  ;;  %v299_v36 = vld [vmem:[%s2952_s3 + $0x18] sm:$0xff] }
   0xe   :  { %2083 = vmatpush3.bf16.msra.mxu0 %v2080_v19  ;;  %2069 = vmatprep.subr.bf16.mxu1 %v2068_v27  ;;  %v2525_v59 = vpack.c.bf16 %v297_v58, %v296_v57  ;;  %v1437_v62 = vld [vmem:[%s2953_s2] ss:$0 sm:$0xff]  ;;  %v301_v44 = vld [vmem:[%s2952_s3 + $0x28] sm:$0xff]  ;;  %v303_v47 = vld [vmem:[%s2952_s3 + $0x38] sm:$0xff] }
   0xf   :  { %2085 = vmatprep.subr.bf16.mxu0 %v2084_v29  ;;  %v305_v50 = vld [vmem:[%s2952_s3 + $0x48] sm:$0xff]  ;;  %v307_v53 = vld [vmem:[%s2952_s3 + $0x58] sm:$0xff]  ;;  %v310_v58 = vld [vmem:[%s2952_s3 + $0x70] sm:$0xff] }
  0x11   :  { %2071 = vmatpush3.bf16.msra.mxu1 %v2068_v27 }
  0x12   :  { %2087 = vmatpush3.bf16.msra.mxu0 %v2084_v29  ;;  %2089 = vmatprep.subr.bf16.mxu1 %v2088_v37 }
  0x14   :  { %1731 = vmatmul.mubr.msk.f32.vlgmr.msra.gmra.mrb[0].mxu1 %vm74_vm0, %v71_v33 }
  0x15   :  { %1753 = vmatmul.mubr.msk.f32.vlgmr.msra.gmra.mrb[0].mxu0 %vm74_vm0, %v42_v18  ;;  %1733 = vmatprep.mubr.msk.f32.mxu1 %vm74_vm0, %v73_v34 }
  0x16   :  { %1755 = vmatprep.mubr.msk.f32.mxu0 %vm74_vm0, %v43_v28  ;;  %2091 = vmatpush3.bf16.msra.mxu1 %v2088_v37 }
  0x17   :  { %2093 = vmatprep.subr.bf16.mxu1 %v2092_v40 }
  0x18   :  { %1734 = vmatmul.mubr.msk.f32.gmra.mrb[2].mxu1 %vm74_vm0, %v72_v32 }
  0x19   :  { %1756 = vmatmul.mubr.msk.f32.gmra.mrb[2].mxu0 %vm74_vm0, %v44_v30 }
  0x1a   :  { %2095 = vmatpush3.bf16.msra.mxu1 %v2092_v40  ;;  %v2120_v40 = vpack.c.bf16 %v299_v36, %v298_v35 }
  0x1b   :  { %2097 = vmatprep.subr.bf16.mxu1 %v2096_v43 }
  0x1e   :  { %2099 = vmatpush3.bf16.msra.mxu1 %v2096_v43  ;;  %v300_v43 = vld [vmem:[%s2952_s3 + $0x20] sm:$0xff] }
  0x1f   :  { %2101 = vmatprep.subr.bf16.mxu1 %v2100_v46  ;;  %v2124_v45 = vpack.c.bf16 %v301_v44, %v300_v43 }
  0x22   :  { %2103 = vmatpush3.bf16.msra.mxu1 %v2100_v46  ;;  %v302_v46 = vld [vmem:[%s2952_s3 + $0x30] sm:$0xff] }
  0x23   :  { %2105 = vmatprep.subr.bf16.mxu1 %v2104_v49  ;;  %v2128_v48 = vpack.c.bf16 %v303_v47, %v302_v46 }
  0x26   :  { %2107 = vmatpush3.bf16.msra.mxu1 %v2104_v49  ;;  %v304_v49 = vld [vmem:[%s2952_s3 + $0x40] sm:$0xff] }
  0x27   :  { %2109 = vmatprep.subr.bf16.mxu1 %v2108_v52  ;;  %v2132_v51 = vpack.c.bf16 %v305_v50, %v304_v49 }
  0x2a   :  { %2111 = vmatpush3.bf16.msra.mxu1 %v2108_v52  ;;  %v306_v52 = vld [vmem:[%s2952_s3 + $0x50] sm:$0xff] }
  0x2b   :  { %2113 = vmatprep.subr.bf16.mxu1 %v2112_v55  ;;  %v2136_v54 = vpack.c.bf16 %v307_v53, %v306_v52 }
  0x2e   :  { %2115 = vmatpush3.bf16.msra.mxu1 %v2112_v55  ;;  %v308_v55 = vld [vmem:[%s2952_s3 + $0x60] sm:$0xff] }
  0x2f   :  { %1786 = vmatprep.subr.mxu1 %v1456_v56 }
  0x32   :  { %1787 = vmatpush3.msra.mxu1 %v1456_v56  ;;  %v309_v56 = vld [vmem:[%s2952_s3 + $0x68] sm:$0xff] }
  0x33   :  { %2117 = vmatprep.subr.bf16.mxu1 %v2525_v59  ;;  %v2140_v57 = vpack.c.bf16 %v309_v56, %v308_v55  ;;  %v563_v55 = vld [vmem:[%s2954_s5 + $0x18] sm:$0xff] }
  0xe7   :  { %v1732_v60 = vpop.f32.mrb[0].mxu1 }
  0xe8   :  { %v1754_v61 = vpop.f32.mrb[0].mxu0  ;;  %v149_v63 = vpop.f32.mrb[1].mxu1 }
  0xe9   :  { %v248_v0 = vadd.f32 %v1754_v61, %v1732_v60  ;;  %v242_v1 = vpop.f32.mrb[1].mxu0  ;;  %v1471_v60 = vld [vmem:[%s2954_s5 + $0x78] sm:$0xff] }
  0xea   :  { %v243_v2 = vadd.f32 %v242_v1, %v149_v63  ;;  %v1473_v63 = vld [vmem:[%s2954_s5 + $0x88] sm:$0xff]  ;;  %v1474_v1 = vld [vmem:[%s2954_s5 + $0x90] sm:$0xff] }
  0xeb   :  { %v269_v3 = vadd.f32 %v1437_v62, %v248_v0  ;;  %v1735_v4 = vpop.f32.mrb[2].mxu1 }
  0xec   :  { %v268_v5 = vadd.f32 %v1437_v62, %v243_v2  ;;  %v1757_v6 = vpop.f32.mrb[2].mxu0  ;;  %v159_v7 = vpop.f32.mrb[3].mxu1  ;;  %v1475_v2 = vld [vmem:[%s2954_s5 + $0x98] sm:$0xff] }
  0xed   :  { %v277_v8 = vmin.f32 %v269_v3, 0.0  ;;  %v258_v9 = vadd.f32 %v1757_v6, %v1735_v4  ;;  %v252_v10 = vpop.f32.mrb[3].mxu0  ;;  %vm273_vm2 = vcmp.gt.f32.partialorder %v269_v3, 0.0  ;;  %v1476_v4 = vld [vmem:[%s2954_s5 + $0xa0] sm:$0xff] }
  0xee   :  { %v276_v11 = vmin.f32 %v268_v5, 0.0  ;;  %v253_v12 = vadd.f32 %v252_v10, %v159_v7  ;;  %vm272_vm3 = vcmp.gt.f32.partialorder %v268_v5, 0.0  ;;  %v1478_v7 = vld [vmem:[%s2954_s5 + $0xb0] sm:$0xff]  ;;  %v1480_v10 = vld [vmem:[%s2954_s5 + $0xc0] sm:$0xff] }
  0xef   :  { %v282_v13 = vmul.f32 1.442695, %v277_v8  ;;  %v271_v14 = vadd.f32 %v1437_v62, %v258_v9  ;;  %v1479_v8 = vld [vmem:[%s2954_s5 + $0xb8] sm:$0xff] }
  0xf0   :  { %v280_v15 = vmul.f32 1.442695, %v276_v11  ;;  %v270_v16 = vadd.f32 %v1437_v62, %v253_v12  ;;  %v1472_v62 = vld [vmem:[%s2954_s5 + $0x80] sm:$0xff]  ;;  %v2160_v9 = vpack.c.bf16 %v1479_v8, %v1478_v7  ;;  %v1481_v11 = vld [vmem:[%s2954_s5 + $0xc8] sm:$0xff]  ;;  %v570_v7 = vld [vmem:[%s2954_s5 + $0x50] sm:$0xff] }
  0xf1   :  { %2307 = vpow2.f32 %v282_v13  ;;  %v279_v17 = vmin.f32 %v271_v14, 0.0  ;;  %vm275_vm5 = vcmp.gt.f32.partialorder %v271_v14, 0.0  ;;  %v2148_v0 = vpack.c.bf16 %v1473_v63, %v1472_v62  ;;  %v1482_v13 = vld [vmem:[%s2954_s5 + $0xd0] sm:$0xff]  ;;  %v564_v62 = vld [vmem:[%s2954_s5 + $0x20] sm:$0xff]  ;;  %v565_v63 = vld [vmem:[%s2954_s5 + $0x28] sm:$0xff] }
  0xf2   :  { %2309 = vpow2.f32 %v280_v15  ;;  %v278_v18 = vmin.f32 %v270_v16, 0.0  ;;  %vm274_vm6 = vcmp.gt.f32.partialorder %v270_v16, 0.0  ;;  %v2164_v12 = vpack.c.bf16 %v1481_v11, %v1480_v10  ;;  %v571_v8 = vld [vmem:[%s2954_s5 + $0x58] sm:$0xff]  ;;  %v572_v10 = vld [vmem:[%s2954_s5 + $0x60] sm:$0xff]  ;;  %v573_v11 = vld [vmem:[%s2954_s5 + $0x68] sm:$0xff] }
  0xf3   :  { %v286_v19 = vmul.f32 1.442695, %v279_v17  ;;  %v561_v17 = vld [vmem:[%s2954_s5 + $0x8] sm:$0xff] }
  0xf4   :  { %v284_v20 = vmul.f32 1.442695, %v278_v18 }
  0xf5   :  { %2311 = vpow2.f32 %v286_v19  ;;  %v2335_v19 = vmov 0.0|0.0  }
  0xf6   :  { %2313 = vpow2.f32 %v284_v20  ;;  %v1497_v20 = vld [vmem:[%s2955_s7 + $0x68] sm:$0xff] }
  0xfb   :  { %v2308_v21 = vpop.eup %2307 }
  0xfc   :  { %v2310_v22 = vpop.eup %2309  ;;  %v1439_v23 = vadd.f32 -1.0, %v2308_v21  ;;  %v1498_v21 = vld [vmem:[%s2955_s7 + $0x70] sm:$0xff] }
  0xfd   :  { %v1438_v24 = vadd.f32 -1.0, %v2310_v22  ;;  %v2201_v22 = vpack.c.bf16 %v1498_v21, %v1497_v20  ;;  %v1518_v20 = vld [vmem:[%s2957_s8 + $0x78] sm:$0xff]  ;;  %v1519_v21 = vld [vmem:[%s2957_s8 + $0x80] sm:$0xff] }
  0xfe   :  { %v293_v25 = vsel %vm273_vm2, %v269_v3, %v1439_v23  ;;  %v2152_v3 = vpack.c.bf16 %v1475_v2, %v1474_v1  ;;  %v1465_v23 = vld [vmem:[%s2956_s4] ss:$0 sm:$0xff]  ;;  %v566_v1 = vld [vmem:[%s2954_s5 + $0x30] sm:$0xff]  ;;  %v567_v2 = vld [vmem:[%s2954_s5 + $0x38] sm:$0xff] }
  0xff   :  { %v2312_v26 = vpop.eup %2311  ;;  %v292_v27 = vsel %vm272_vm3, %v268_v5, %v1438_v24  ;;  %v332_v28 = vrot.slane %v293_v25, 2  ;;  %v1477_v5 = vld [vmem:[%s2954_s5 + $0xa8] sm:$0xff]  ;;  %vm1415_vm3 = vcmask 388096  }
 0x100   :  { %v2314_v29 = vpop.eup %2313  ;;  %v1441_v30 = vadd.f32 -1.0, %v2312_v26  ;;  %v331_v31 = vrot.slane %v292_v27, 2  ;;  %v2156_v6 = vpack.c.bf16 %v1477_v5, %v1476_v4  ;;  %v568_v4 = vld [vmem:[%s2954_s5 + $0x40] sm:$0xff]  ;;  %v569_v5 = vld [vmem:[%s2954_s5 + $0x48] sm:$0xff] }
 0x101   :  { %v1440_v32 = vadd.f32 -1.0, %v2314_v29 }
 0x102   :  { %v295_v33 = vsel %vm275_vm5, %v271_v14, %v1441_v30  ;;  %v333_v34 = vsel %vm66_vm1, %v331_v31, %v332_v28  ;;  %v1483_v14 = vld [vmem:[%s2954_s5 + $0xd8] sm:$0xff]  ;;  %vm1413_vm5 = vcmask 392192  }
 0x103   :  { %v294_v37 = vsel %vm274_vm6, %v270_v16, %v1440_v32  ;;  %1788 = vmatprep.mubr.msk.f32.mxu1 %vm338_vm4, %v333_v34  ;;  %v336_v38 = vrot.slane %v295_v33, 2  ;;  %v2168_v15 = vpack.c.bf16 %v1483_v14, %v1482_v13  ;;  %v560_v16 = vld [vmem:[%s2954_s5] sm:$0xff]  ;;  %v1516_v13 = vld [vmem:[%s2957_s8 + $0x68] sm:$0xff]  ;;  %v1517_v14 = vld [vmem:[%s2957_s8 + $0x70] sm:$0xff] }
 0x104   :  { %v334_v39 = vrot.slane %v294_v37, 2  ;;  %v2630_v18 = vpack.c.bf16 %v561_v17, %v560_v16  ;;  %v1499_v16 = vld [vmem:[%s2955_s7 + $0x78] sm:$0xff]  ;;  %v1500_v17 = vld [vmem:[%s2955_s7 + $0x80] sm:$0xff] }
 0x106   :  { %v335_v41 = vsel %vm66_vm1, %v332_v28, %v334_v39  ;;  %v337_v42 = vsel %vm66_vm1, %v334_v39, %v336_v38 }
 0x107   :  { %1789 = vmatmul.mubr.msk.f32.vlgmr.msra.gmra.mrb[4].mxu1 %vm338_vm4, %v335_v41 }
 0x108   :  { %2119 = vmatpush3.bf16.msra.mxu1 %v2525_v59  ;;  %1791 = vmatprep.mubr.msk.f32.mxu1 %vm338_vm4, %v337_v42  ;;  %v1470_v59 = vld [vmem:[%s2954_s5 + $0x70] sm:$0xff] }
 0x109   :  { %2121 = vmatprep.subr.bf16.mxu1 %v2120_v40  ;;  %v2144_v61 = vpack.c.bf16 %v1471_v60, %v1470_v59 }
 0x10b   :  { %1792 = vmatmul.mubr.msk.f32.gmra.mrb[6].mxu1 %vm338_vm4, %v336_v38  ;;  %2145 = vmatprep.subr.bf16.mxu0 %v2144_v61 }
 0x10c   :  { %2123 = vmatpush3.bf16.msra.mxu1 %v2120_v40  ;;  %1824 = vmatprep.mubr.msk.f32.mxu1 %vm338_vm4, %v292_v27 }
 0x10d   :  { %2125 = vmatprep.subr.bf16.mxu1 %v2124_v45  ;;  %2147 = vmatpush3.bf16.msra.mxu0 %v2144_v61 }
 0x10e   :  { %2149 = vmatprep.subr.bf16.mxu0 %v2148_v0 }
 0x110   :  { %2127 = vmatpush3.bf16.msra.mxu1 %v2124_v45 }
 0x111   :  { %2129 = vmatprep.subr.bf16.mxu1 %v2128_v48  ;;  %2151 = vmatpush3.bf16.msra.mxu0 %v2148_v0  ;;  %v2180_v0 = vpack.c.bf16 %v565_v63, %v564_v62 }
 0x112   :  { %2153 = vmatprep.subr.bf16.mxu0 %v2152_v3 }
 0x114   :  { %2131 = vmatpush3.bf16.msra.mxu1 %v2128_v48 }
 0x115   :  { %2133 = vmatprep.subr.bf16.mxu1 %v2132_v51  ;;  %2155 = vmatpush3.bf16.msra.mxu0 %v2152_v3  ;;  %v2184_v3 = vpack.c.bf16 %v567_v2, %v566_v1 }
 0x116   :  { %2157 = vmatprep.subr.bf16.mxu0 %v2156_v6 }
 0x118   :  { %2135 = vmatpush3.bf16.msra.mxu1 %v2132_v51 }
 0x119   :  { %2137 = vmatprep.subr.bf16.mxu1 %v2136_v54  ;;  %2159 = vmatpush3.bf16.msra.mxu0 %v2156_v6  ;;  %v2188_v6 = vpack.c.bf16 %v569_v5, %v568_v4 }
 0x11a   :  { %2161 = vmatprep.subr.bf16.mxu0 %v2160_v9 }
 0x11c   :  { %2139 = vmatpush3.bf16.msra.mxu1 %v2136_v54  ;;  %v562_v54 = vld [vmem:[%s2954_s5 + $0x10] sm:$0xff] }
 0x11d   :  { %2141 = vmatprep.subr.bf16.mxu1 %v2140_v57  ;;  %2163 = vmatpush3.bf16.msra.mxu0 %v2160_v9  ;;  %v2176_v59 = vpack.c.bf16 %v563_v55, %v562_v54  ;;  %v2192_v9 = vpack.c.bf16 %v571_v8, %v570_v7  ;;  %v823_v8 = vld [vmem:[%s2955_s7 + $0x8] sm:$0xff] }
 0x11e   :  { %2165 = vmatprep.subr.bf16.mxu0 %v2164_v12 }
 0x120   :  { %2143 = vmatpush3.bf16.msra.mxu1 %v2140_v57 }
 0x121   :  { %1822 = vmatprep.subr.mxu1 %v310_v58  ;;  %2167 = vmatpush3.bf16.msra.mxu0 %v2164_v12  ;;  %v2196_v12 = vpack.c.bf16 %v573_v11, %v572_v10  ;;  %v836_v10 = vld [vmem:[%s2957_s8 + $0x8] sm:$0xff] }
 0x122   :  { %2169 = vmatprep.subr.bf16.mxu0 %v2168_v15 }
 0x124   :  { %1823 = vmatpush3.msra.mxu1 %v310_v58 }
 0x125   :  { %1825 = vmatmul.mubr.msk.f32.vlgmr.msra.gmra.mrb[4].mxu1 %vm338_vm4, %v293_v25  ;;  %2171 = vmatpush3.bf16.msra.mxu0 %v2168_v15  ;;  %v2237_v15 = vpack.c.bf16 %v1517_v14, %v1516_v13 }
 0x126   :  { %1827 = vmatprep.mubr.msk.f32.mxu1 %vm338_vm4, %v294_v37  ;;  %2173 = vmatprep.subr.bf16.mxu0 %v2630_v18 }
 0x127   :  { %2200 = vmatprep.subr.bf16.mxu1 %v2335_v19 }
 0x128   :  { %2202 = vmatpush3.bf16.msra.mxu1 %v2201_v22  ;;  %v2240_v22 = vpack.c.bf16 %v1519_v21, %v1518_v20  ;;  %v824_v21 = vld [vmem:[%s2955_s7 + $0x10] sm:$0xff] }
 0x129   :  { %1828 = vmatmul.mubr.msk.f32.gmra.mrb[6].mxu1 %vm338_vm4, %v295_v33  ;;  %2203 = vmatprep.subr.bf16.mxu1 %v2335_v19 }
 0x1f8   :  { %v1826_v24 = vpop.f32.mrb[4].mxu1 }
 0x1f9   :  { %v533_v25 = vadd.f32 %v1826_v24, %v1465_v23  ;;  %v506_v26 = vpop.f32.mrb[5].mxu1  ;;  %v1502_v24 = vld [vmem:[%s2955_s7 + $0x90] sm:$0xff] }
 0x1fa   :  { %v532_v27 = vadd.f32 %v1465_v23, %v506_v26 }
 0x1fb   :  { %v541_v28 = vmin.f32 %v533_v25, 0.0  ;;  %vm537_vm7 = vcmp.gt.f32.partialorder %v533_v25, 0.0 }
 0x1fc   :  { %v540_v29 = vmin.f32 %v532_v27, 0.0  ;;  %v1829_v30 = vpop.f32.mrb[6].mxu1  ;;  %vm536_vm8 = vcmp.gt.f32.partialorder %v532_v27, 0.0 }
 0x1fd   :  { %v546_v31 = vmul.f32 1.442695, %v541_v28  ;;  %v535_v32 = vadd.f32 %v1829_v30, %v1465_v23  ;;  %v516_v33 = vpop.f32.mrb[7].mxu1  ;;  %v1504_v30 = vld [vmem:[%s2955_s7 + $0xa0] sm:$0xff] }
 0x1fe   :  { %v544_v34 = vmul.f32 1.442695, %v540_v29  ;;  %v534_v35 = vadd.f32 %v1465_v23, %v516_v33  ;;  %v1501_v23 = vld [vmem:[%s2955_s7 + $0x88] sm:$0xff]  ;;  %v1503_v29 = vld [vmem:[%s2955_s7 + $0x98] sm:$0xff]  ;;  %v1523_v33 = vld [vmem:[%s2957_s8 + $0xa0] sm:$0xff] }
 0x1ff   :  { %2315 = vpow2.f32 %v546_v31  ;;  %v543_v36 = vmin.f32 %v535_v32, 0.0  ;;  %vm539_vm10 = vcmp.gt.f32.partialorder %v535_v32, 0.0  ;;  %v2207_v26 = vpack.c.bf16 %v1502_v24, %v1501_v23  ;;  %v1522_v31 = vld [vmem:[%s2957_s8 + $0x98] sm:$0xff]  ;;  %v837_v24 = vld [vmem:[%s2957_s8 + $0x10] sm:$0xff] }
 0x200   :  { %2317 = vpow2.f32 %v544_v34  ;;  %v542_v37 = vmin.f32 %v534_v35, 0.0  ;;  %vm538_vm11 = vcmp.gt.f32.partialorder %v534_v35, 0.0  ;;  %v2246_v34 = vpack.c.bf16 %v1523_v33, %v1522_v31  ;;  %v825_v23 = vld [vmem:[%s2955_s7 + $0x18] sm:$0xff]  ;;  %v826_v33 = vld [vmem:[%s2955_s7 + $0x20] sm:$0xff] }
 0x201   :  { %v550_v38 = vmul.f32 1.442695, %v543_v36  ;;  %v1506_v36 = vld [vmem:[%s2955_s7 + $0xb0] sm:$0xff]  ;;  %v2222_v31 = vpack.c.bf16 %v825_v23, %v824_v21 }
 0x202   :  { %v548_v39 = vmul.f32 1.442695, %v542_v37  ;;  %v1524_v37 = vld [vmem:[%s2957_s8 + $0xa8] sm:$0xff] }
 0x203   :  { %2319 = vpow2.f32 %v550_v38 }
 0x204   :  { %2321 = vpow2.f32 %v548_v39  ;;  %v1525_v39 = vld [vmem:[%s2957_s8 + $0xb0] sm:$0xff] }
 0x209   :  { %v2316_v40 = vpop.eup %2315 }
 0x20a   :  { %v2318_v41 = vpop.eup %2317  ;;  %v1467_v42 = vadd.f32 -1.0, %v2316_v40  ;;  %v2249_v40 = vpack.c.bf16 %v1525_v39, %v1524_v37 }
 0x20b   :  { %v1466_v43 = vadd.f32 -1.0, %v2318_v41  ;;  %v1507_v41 = vld [vmem:[%s2955_s7 + $0xb8] sm:$0xff] }
 0x20c   :  { %v557_v44 = vsel %vm537_vm7, %v533_v25, %v1467_v42  ;;  %v1520_v25 = vld [vmem:[%s2957_s8 + $0x88] sm:$0xff]  ;;  %v1508_v42 = vld [vmem:[%s2955_s7 + $0xc0] sm:$0xff] }
 0x20d   :  { %v2320_v45 = vpop.eup %2319  ;;  %v594_v46 = vrot.slane %v557_v44, 2  ;;  %v556_v47 = vsel %vm536_vm8, %v532_v27, %v1466_v43  ;;  %v1521_v27 = vld [vmem:[%s2957_s8 + $0x90] sm:$0xff]  ;;  %v1526_v43 = vld [vmem:[%s2957_s8 + $0xb8] sm:$0xff] }
 0x20e   :  { %v2322_v48 = vpop.eup %2321  ;;  %v593_v49 = vrot.slane %v556_v47, 2  ;;  %v1469_v50 = vadd.f32 -1.0, %v2320_v45  ;;  %v2243_v28 = vpack.c.bf16 %v1521_v27, %v1520_v25  ;;  %v1527_v45 = vld [vmem:[%s2957_s8 + $0xc0] sm:$0xff]  ;;  %v838_v25 = vld [vmem:[%s2957_s8 + $0x18] sm:$0xff] }
 0x20f   :  { %v1468_v51 = vadd.f32 -1.0, %v2322_v48  ;;  %v1509_v48 = vld [vmem:[%s2955_s7 + $0xc8] sm:$0xff] }
 0x210   :  { %v559_v52 = vsel %vm539_vm10, %v535_v32, %v1469_v50  ;;  %v595_v53 = vsel %vm66_vm1, %v593_v49, %v594_v46  ;;  %v2210_v32 = vpack.c.bf16 %v1504_v30, %v1503_v29  ;;  %v1528_v49 = vld [vmem:[%s2957_s8 + $0xc8] sm:$0xff]  ;;  %v1492_v50 = vld [vmem:[%s2958_s6] ss:$0 sm:$0xff] }
 0x211   :  { %v598_v56 = vrot.slane %v559_v52, 2  ;;  %v558_v57 = vsel %vm538_vm11, %v534_v35, %v1468_v51  ;;  %1858 = vmatprep.mubr.msk.f32.mxu0 %vm600_vm9, %v595_v53  ;;  %v1505_v35 = vld [vmem:[%s2955_s7 + $0xa8] sm:$0xff] }
 0x212   :  { %v596_v58 = vrot.slane %v558_v57, 2  ;;  %v2213_v38 = vpack.c.bf16 %v1506_v36, %v1505_v35  ;;  %v839_v35 = vld [vmem:[%s2957_s8 + $0x20] sm:$0xff]  ;;  %v840_v36 = vld [vmem:[%s2957_s8 + $0x28] sm:$0xff] }
 0x214   :  { %v597_v60 = vsel %vm66_vm1, %v594_v46, %v596_v58  ;;  %v599_v61 = vsel %vm66_vm1, %v596_v58, %v598_v56  ;;  %v2252_v46 = vpack.c.bf16 %v1527_v45, %v1526_v43  ;;  %v841_v43 = vld [vmem:[%s2957_s8 + $0x30] sm:$0xff] }
 0x215   :  { %1859 = vmatmul.mubr.msk.f32.vlgmr.msra.gmra.mrb[4].mxu0 %vm600_vm9, %v597_v60 }
 0x216   :  { %2175 = vmatpush3.bf16.msra.mxu0 %v2630_v18  ;;  %1861 = vmatprep.mubr.msk.f32.mxu0 %vm600_vm9, %v599_v61  ;;  %v2204_v18 = vpack.c.bf16 %v1500_v17, %v1499_v16 }
 0x217   :  { %2177 = vmatprep.subr.bf16.mxu0 %v2176_v59 }
 0x218   :  { %2205 = vmatpush3.bf16.msra.mxu1 %v2204_v18 }
 0x219   :  { %1862 = vmatmul.mubr.msk.f32.gmra.mrb[6].mxu0 %vm600_vm9, %v598_v56  ;;  %2206 = vmatprep.subr.bf16.mxu1 %v2335_v19 }
 0x21a   :  { %2179 = vmatpush3.bf16.msra.mxu0 %v2176_v59  ;;  %1892 = vmatprep.mubr.msk.f32.mxu0 %vm600_vm9, %v556_v47  ;;  %v2336_v47 = vmov 0.0  }
 0x21b   :  { %2181 = vmatprep.subr.bf16.mxu0 %v2180_v0  ;;  %1924 = vmatprep.mubr.msk.f32.mxu1 %vm2337_vm12, %v2336_v47 }
 0x21c   :  { %2208 = vmatpush3.bf16.msra.mxu1 %v2207_v26 }
 0x21d   :  { %2209 = vmatprep.subr.bf16.mxu1 %v2335_v19 }
 0x21e   :  { %2183 = vmatpush3.bf16.msra.mxu0 %v2180_v0 }
 0x21f   :  { %2185 = vmatprep.subr.bf16.mxu0 %v2184_v3 }
 0x220   :  { %2211 = vmatpush3.bf16.msra.mxu1 %v2210_v32  ;;  %v2258_v32 = vpack.c.bf16 %v838_v25, %v837_v24 }
 0x221   :  { %2212 = vmatprep.subr.bf16.mxu1 %v2335_v19 }
 0x222   :  { %2187 = vmatpush3.bf16.msra.mxu0 %v2184_v3 }
 0x223   :  { %2189 = vmatprep.subr.bf16.mxu0 %v2188_v6 }
 0x224   :  { %2214 = vmatpush3.bf16.msra.mxu1 %v2213_v38 }
 0x225   :  { %2215 = vmatprep.subr.bf16.mxu1 %v2335_v19 }
 0x226   :  { %2191 = vmatpush3.bf16.msra.mxu0 %v2188_v6  ;;  %v822_v6 = vld [vmem:[%s2955_s7] sm:$0xff] }
 0x227   :  { %2193 = vmatprep.subr.bf16.mxu0 %v2192_v9  ;;  %v2219_v18 = vpack.c.bf16 %v823_v8, %v822_v6 }
 0x22a   :  { %2195 = vmatpush3.bf16.msra.mxu0 %v2192_v9  ;;  %v835_v9 = vld [vmem:[%s2957_s8] sm:$0xff] }
 0x22b   :  { %2197 = vmatprep.subr.bf16.mxu0 %v2196_v12  ;;  %v2255_v20 = vpack.c.bf16 %v836_v10, %v835_v9 }
 0x22e   :  { %2199 = vmatpush3.bf16.msra.mxu0 %v2196_v12 }
 0x22f   :  { %2236 = vmatprep.subr.bf16.mxu0 %v2335_v19 }
 0x231   :  { %1893 = vmatmul.mubr.msk.f32.vlgmr.msra.gmra.mrb[4].mxu0 %vm600_vm9, %v557_v44  ;;  %v2216_v44 = vpack.c.bf16 %v1508_v42, %v1507_v41  ;;  %v828_v41 = vld [vmem:[%s2955_s7 + $0x30] sm:$0xff]  ;;  %v829_v42 = vld [vmem:[%s2955_s7 + $0x38] sm:$0xff] }
 0x232   :  { %1895 = vmatprep.mubr.msk.f32.mxu0 %vm600_vm9, %v558_v57  ;;  %2238 = vmatpush3.bf16.msra.mxu0 %v2237_v15  ;;  %v2228_v45 = vpack.c.bf16 %v829_v42, %v828_v41 }
 0x233   :  { %2239 = vmatprep.subr.bf16.mxu0 %v2335_v19  ;;  %2217 = vmatpush3.bf16.msra.mxu1 %v2216_v44  ;;  %v842_v44 = vld [vmem:[%s2957_s8 + $0x38] sm:$0xff] }
 0x234   :  { %1922 = vmatprep.subr.mxu1 %v2336_v47 }
 0x235   :  { %1896 = vmatmul.mubr.msk.f32.gmra.mrb[6].mxu0 %vm600_vm9, %v559_v52 }
 0x236   :  { %2241 = vmatpush3.bf16.msra.mxu0 %v2240_v22  ;;  %1994 = vmatprep.mubr.msk.f32.mxu0 %vm2337_vm12, %v2336_v47 }
 0x237   :  { %2242 = vmatprep.subr.bf16.mxu0 %v2335_v19  ;;  %1923 = vmatpush3.msra.mxu1 %v1509_v48  ;;  %v830_v48 = vld [vmem:[%s2955_s7 + $0x40] sm:$0xff] }
 0x238   :  { %2218 = vmatprep.subr.bf16.mxu1 %v2335_v19 }
 0x23a   :  { %2244 = vmatpush3.bf16.msra.mxu0 %v2243_v28 }
 0x23b   :  { %2245 = vmatprep.subr.bf16.mxu0 %v2335_v19 }
 0x23e   :  { %2247 = vmatpush3.bf16.msra.mxu0 %v2246_v34  ;;  %v827_v34 = vld [vmem:[%s2955_s7 + $0x28] sm:$0xff] }
 0x23f   :  { %2248 = vmatprep.subr.bf16.mxu0 %v2335_v19  ;;  %v2225_v39 = vpack.c.bf16 %v827_v34, %v826_v33 }
 0x242   :  { %2250 = vmatpush3.bf16.msra.mxu0 %v2249_v40  ;;  %v2261_v40 = vpack.c.bf16 %v840_v36, %v839_v35 }
 0x243   :  { %2251 = vmatprep.subr.bf16.mxu0 %v2335_v19 }
 0x246   :  { %2253 = vmatpush3.bf16.msra.mxu0 %v2252_v46  ;;  %v2264_v46 = vpack.c.bf16 %v842_v44, %v841_v43 }
 0x247   :  { %1992 = vmatprep.subr.mxu0 %v2336_v47 }
 0x24a   :  { %1993 = vmatpush3.msra.mxu0 %v1528_v49  ;;  %v831_v49 = vld [vmem:[%s2955_s7 + $0x48] sm:$0xff] }
 0x24b   :  { %2254 = vmatprep.subr.bf16.mxu0 %v2335_v19 }
 0x304   :  { %v1894_v51 = vpop.f32.mrb[4].mxu0 }
 0x305   :  { %v795_v52 = vadd.f32 %v1894_v51, %v1492_v50  ;;  %v768_v53 = vpop.f32.mrb[5].mxu0  ;;  %v844_v51 = vld [vmem:[%s2957_s8 + $0x48] sm:$0xff] }
 0x306   :  { %v794_v54 = vadd.f32 %v1492_v50, %v768_v53 }
 0x307   :  { %v803_v55 = vmin.f32 %v795_v52, 0.0  ;;  %vm799_vm13 = vcmp.gt.f32.partialorder %v795_v52, 0.0 }
 0x308   :  { %v802_v56 = vmin.f32 %v794_v54, 0.0  ;;  %v1897_v57 = vpop.f32.mrb[6].mxu0  ;;  %vm798_vm14 = vcmp.gt.f32.partialorder %v794_v54, 0.0 }
 0x309   :  { %v808_v58 = vmul.f32 1.442695, %v803_v55  ;;  %v797_v59 = vadd.f32 %v1897_v57, %v1492_v50  ;;  %v778_v60 = vpop.f32.mrb[7].mxu0  ;;  %v833_v55 = vld [vmem:[%s2955_s7 + $0x58] sm:$0xff] }
 0x30a   :  { %v806_v61 = vmul.f32 1.442695, %v802_v56  ;;  %v796_v62 = vadd.f32 %v1492_v50, %v778_v60  ;;  %v843_v50 = vld [vmem:[%s2957_s8 + $0x40] sm:$0xff]  ;;  %v845_v56 = vld [vmem:[%s2957_s8 + $0x50] sm:$0xff]  ;;  %v846_v57 = vld [vmem:[%s2957_s8 + $0x58] sm:$0xff] }
 0x30b   :  { %2323 = vpow2.f32 %v808_v58  ;;  %v805_v63 = vmin.f32 %v797_v59, 0.0  ;;  %vm801_vm0 = vcmp.gt.f32.partialorder %v797_v59, 0.0  ;;  %v2267_v53 = vpack.c.bf16 %v844_v51, %v843_v50  ;;  %v834_v60 = vld [vmem:[%s2955_s7 + $0x60] sm:$0xff] }
 0x30c   :  { %2325 = vpow2.f32 %v806_v61  ;;  %v804_v0 = vmin.f32 %v796_v62, 0.0  ;;  %vm800_vm2 = vcmp.gt.f32.partialorder %v796_v62, 0.0  ;;  %v847_v61 = vld [vmem:[%s2957_s8 + $0x60] sm:$0xff] }
 0x30d   :  { %v812_v1 = vmul.f32 1.442695, %v805_v63 }
 0x30e   :  { %v810_v2 = vmul.f32 1.442695, %v804_v0 }
 0x30f   :  { %2327 = vpow2.f32 %v812_v1 }
 0x310   :  { %2329 = vpow2.f32 %v810_v2 }
 0x315   :  { %v2324_v3 = vpop.eup %2323 }
 0x316   :  { %v2326_v4 = vpop.eup %2325  ;;  %v1494_v5 = vadd.f32 -1.0, %v2324_v3 }
 0x317   :  { %v1493_v7 = vadd.f32 -1.0, %v2326_v4 }
 0x318   :  { %v2797_v11 = vsel %vm799_vm13, %v795_v52, %v1494_v5  ;;  %v2231_v52 = vpack.c.bf16 %v831_v49, %v830_v48 }
 0x319   :  { %v2328_v12 = vpop.eup %2327  ;;  %v867_v13 = vrot.slane %v2797_v11, 2  ;;  %v2800_v14 = vsel %vm798_vm14, %v794_v54, %v1493_v7  ;;  %v832_v54 = vld [vmem:[%s2955_s7 + $0x50] sm:$0xff] }
 0x31a   :  { %v2330_v15 = vpop.eup %2329  ;;  %v866_v16 = vrot.slane %v2800_v14, 2  ;;  %v1496_v17 = vadd.f32 -1.0, %v2328_v12  ;;  %v2234_v58 = vpack.c.bf16 %v833_v55, %v832_v54 }
 0x31b   :  { %v1495_v22 = vadd.f32 -1.0, %v2330_v15  ;;  %v1308_v15 = vld [vmem:[%s2960_s11 + $0x8] sm:$0xf] }
 0x31c   :  { %v821_v26 = vsel %vm801_vm0, %v797_v59, %v1496_v17  ;;  %v868_v27 = vsel %vm66_vm1, %v866_v16, %v867_v13  ;;  %v2270_v59 = vpack.c.bf16 %v846_v57, %v845_v56 }
 0x31d   :  { %v871_v28 = vrot.slane %v821_v26, 2  ;;  %v2816_v29 = vsel %vm800_vm2, %v796_v62, %v1495_v22  ;;  %1925 = vmatmul.mubr.msk.f32.vlgmr.msra.gmra.mrb[8].mxu1 %vm873_vm15, %v868_v27  ;;  %1995 = vmatmul.mubr.msk.f32.vlgmr.msra.gmra.mrb[8].mxu0 %vm873_vm15, %v868_v27  ;;  %v1307_v62 = vld [vmem:[%s2960_s11] sm:$0xff] }
 0x31e   :  { %v869_v30 = vrot.slane %v2816_v29, 2  ;;  %2220 = vmatpush3.bf16.msra.mxu1 %v2219_v18  ;;  %2256 = vmatpush3.bf16.msra.mxu0 %v2255_v20  ;;  %v1539_v18 = vld [vmem:[%s2961_s9] ss:$0 sm:$0xff] }
 0x31f   :  { %1927 = vmatprep.mubr.msk.f32.mxu1 %vm2337_vm12, %v2336_v47  ;;  %2221 = vmatprep.subr.bf16.mxu1 %v2335_v19 }
 0x320   :  { %1997 = vmatprep.mubr.msk.f32.mxu0 %vm2337_vm12, %v2336_v47  ;;  %2257 = vmatprep.subr.bf16.mxu0 %v2335_v19  ;;  %v870_v37 = vsel %vm66_vm1, %v867_v13, %v869_v30  ;;  %v872_v38 = vsel %vm66_vm1, %v869_v30, %v871_v28  ;;  %vm1225_vm1 = vcmask 195584  }
 0x321   :  { %1928 = vmatmul.mubr.msk.f32.gmra.mrb[10].mxu1 %vm873_vm15, %v870_v37  ;;  %1998 = vmatmul.mubr.msk.f32.gmra.mrb[10].mxu0 %vm873_vm15, %v870_v37 }
 0x322   :  { %2223 = vmatpush3.bf16.msra.mxu1 %v2222_v31  ;;  %2259 = vmatpush3.bf16.msra.mxu0 %v2258_v32 }
 0x323   :  { %1930 = vmatprep.mubr.msk.f32.mxu1 %vm2337_vm12, %v2336_v47  ;;  %2224 = vmatprep.subr.bf16.mxu1 %v2335_v19 }
 0x324   :  { %2000 = vmatprep.mubr.msk.f32.mxu0 %vm2337_vm12, %v2336_v47  ;;  %2260 = vmatprep.subr.bf16.mxu0 %v2335_v19 }
 0x325   :  { %1931 = vmatmul.mubr.msk.f32.gmra.mrb[12].mxu1 %vm873_vm15, %v872_v38  ;;  %2001 = vmatmul.mubr.msk.f32.gmra.mrb[12].mxu0 %vm873_vm15, %v872_v38 }
 0x326   :  { %2226 = vmatpush3.bf16.msra.mxu1 %v2225_v39  ;;  %2262 = vmatpush3.bf16.msra.mxu0 %v2261_v40 }
 0x327   :  { %2227 = vmatprep.subr.bf16.mxu1 %v2335_v19  ;;  %2263 = vmatprep.subr.bf16.mxu0 %v2335_v19 }
 0x328   :  { %1959 = vmatprep.mubr.msk.f32.mxu1 %vm2337_vm12, %v2336_v47  ;;  %2029 = vmatprep.mubr.msk.f32.mxu0 %vm2337_vm12, %v2336_v47 }
 0x32a   :  { %2229 = vmatpush3.bf16.msra.mxu1 %v2228_v45  ;;  %2265 = vmatpush3.bf16.msra.mxu0 %v2264_v46 }
 0x32b   :  { %2230 = vmatprep.subr.bf16.mxu1 %v2335_v19  ;;  %2266 = vmatprep.subr.bf16.mxu0 %v2335_v19 }
 0x32e   :  { %2232 = vmatpush3.bf16.msra.mxu1 %v2231_v52  ;;  %2268 = vmatpush3.bf16.msra.mxu0 %v2267_v53 }
 0x32f   :  { %2233 = vmatprep.subr.bf16.mxu1 %v2335_v19  ;;  %2269 = vmatprep.subr.bf16.mxu0 %v2335_v19  ;;  %v1223_v19 = vld [vmem:[%s2959_s10] sm:$0xff] }
 0x332   :  { %2235 = vmatpush3.bf16.msra.mxu1 %v2234_v58  ;;  %2271 = vmatpush3.bf16.msra.mxu0 %v2270_v59 }
 0x333   :  { %1957 = vmatprep.subr.mxu1 %v2336_v47  ;;  %2027 = vmatprep.subr.mxu0 %v2336_v47 }
 0x336   :  { %1958 = vmatpush3.msra.mxu1 %v834_v60  ;;  %2028 = vmatpush3.msra.mxu0 %v847_v61 }
 0x337   :  { %1960 = vmatmul.mubr.msk.f32.vlgmr.msra.gmra.mrb[8].mxu1 %vm873_vm15, %v2800_v14  ;;  %2030 = vmatmul.mubr.msk.f32.vlgmr.msra.gmra.mrb[8].mxu0 %vm873_vm15, %v2800_v14  ;;  %v1224_v14 = vld [vmem:[%s2959_s10 + $0x8] sm:$0xf] }
 0x338   :  { %1962 = vmatprep.mubr.msk.f32.mxu1 %vm2337_vm12, %v2336_v47  ;;  %2032 = vmatprep.mubr.msk.f32.mxu0 %vm2337_vm12, %v2336_v47 }
 0x33b   :  { %1963 = vmatmul.mubr.msk.f32.gmra.mrb[10].mxu1 %vm873_vm15, %v2797_v11  ;;  %2033 = vmatmul.mubr.msk.f32.gmra.mrb[10].mxu0 %vm873_vm15, %v2797_v11 }
 0x33c   :  { %1965 = vmatprep.mubr.msk.f32.mxu1 %vm2337_vm12, %v2336_v47  ;;  %2035 = vmatprep.mubr.msk.f32.mxu0 %vm2337_vm12, %v2336_v47 }
 0x33f   :  { %1966 = vmatmul.mubr.msk.f32.gmra.mrb[12].mxu1 %vm873_vm15, %v2816_v29  ;;  %2036 = vmatmul.mubr.msk.f32.gmra.mrb[12].mxu0 %vm873_vm15, %v2816_v29 }
 0x340   :  { %2044 = vmatprep.mubr.msk.f32.mxu0 %vm1225_vm1, %v1223_v19  ;;  %2053 = vmatprep.mubr.msk.f32.mxu1 %vm1225_vm1, %v1307_v62 }
 0x40a   :  { %v1032_v47 = vpop.f32.mrb[8].mxu1  ;;  %v1206_v63 = vpop.f32.mrb[8].mxu0 }
 0x40b   :  { %v1220_v0 = vmax.f32 %v1032_v47, %v1206_v63  ;;  %v1961_v1 = vpop.f32.mrb[9].mxu1  ;;  %v2031_v2 = vpop.f32.mrb[9].mxu0 }
 0x40e   :  { %v1037_v3 = vpop.f32.mrb[10].mxu1  ;;  %v1211_v4 = vpop.f32.mrb[10].mxu0 }
 0x40f   :  { %v1221_v5 = vmax.f32 %v1037_v3, %v1211_v4  ;;  %v1964_v6 = vpop.f32.mrb[11].mxu1  ;;  %v2034_v7 = vpop.f32.mrb[11].mxu0 }
 0x411   :  { %v2272_v8 = vpack.c.bf16 %v1221_v5, %v1220_v0 }
 0x412   :  { %v1042_v9 = vpop.f32.mrb[12].mxu1  ;;  %v1216_v10 = vpop.f32.mrb[12].mxu0 }
 0x413   :  { %v1222_v11 = vmax.f32 %v1042_v9, %v1216_v10  ;;  %v1967_v12 = vpop.f32.mrb[13].mxu1  ;;  %v2037_v13 = vpop.f32.mrb[13].mxu0  ;;  %2273 = vmatprep.subr.bf16.mxu0 %v2272_v8  ;;  %2277 = vmatprep.subr.bf16.mxu1 %v2272_v8 }
 0x414   :  { %2275 = vmatpush3.bf16.msra.mxu0 %v2272_v8  ;;  %2279 = vmatpush3.bf16.msra.mxu1 %v2272_v8 }
 0x415   :  { %2042 = vmatprep.subr.mxu0 %v1222_v11  ;;  %2051 = vmatprep.subr.mxu1 %v1222_v11 }
 0x418   :  { %2043 = vmatpush3.msra.mxu0 %v1222_v11  ;;  %2052 = vmatpush3.msra.mxu1 %v1222_v11 }
 0x419   :  { %2045 = vmatmul.mubr.msk.f32.vlgmr.msra.gmra.mrb[14].mxu0 %vm1225_vm1, %v1224_v14  ;;  %2054 = vmatmul.mubr.msk.f32.vlgmr.msra.gmra.mrb[14].mxu1 %vm1225_vm1, %v1308_v15 }
 0x4ec   :  { %v2046_v16 = vpop.f32.mrb[14].mxu0  ;;  %v2055_v17 = vpop.f32.mrb[14].mxu1 }
 0x4ed   :  { %v1391_v20 = vmax.f32 %v2046_v16, %v2055_v17  ;;  %v1298_v21 = vpop.f32.mrb[15].mxu0  ;;  %v1381_v22 = vpop.f32.mrb[15].mxu1 }
 0x4ee   :  { %v1390_v23 = vmax.f32 %v1298_v21, %v1381_v22 }
 0x4ef   :  { %v1400_v24 = vadd.f32 %v1539_v18, %v1391_v20 }
 0x4f0   :  { %v1399_v25 = vadd.f32 %v1539_v18, %v1390_v23 }
 0x4f1   :  { %v1404_v26 = vmin.f32 %v1400_v24, 0.0  ;;  %vm1402_vm4 = vcmp.gt.f32.partialorder %v1400_v24, 0.0 }
 0x4f2   :  { %v1403_v27 = vmin.f32 %v1399_v25, 0.0  ;;  %vm1401_vm6 = vcmp.gt.f32.partialorder %v1399_v25, 0.0 }
 0x4f3   :  { %v1407_v28 = vmul.f32 1.442695, %v1404_v26 }
 0x4f4   :  { %v1405_v29 = vmul.f32 1.442695, %v1403_v27 }
 0x4f5   :  { %2331 = vpow2.f32 %v1407_v28 }
 0x4f6   :  { %2333 = vpow2.f32 %v1405_v29 }
 0x4ff   :  { %v2332_v30 = vpop.eup %2331 }
 0x500   :  { %v2334_v31 = vpop.eup %2333  ;;  %v1541_v32 = vadd.f32 -1.0, %v2332_v30 }
 0x501   :  { %v1540_v33 = vadd.f32 -1.0, %v2334_v31 }
 0x502   :  { %v1412_v34 = vsel %vm1402_vm4, %v1400_v24, %v1541_v32 }
 0x503   :  { %1416 = vst.msk [vmem:[%s2962_s12 + $0x8] sm:$0xf] %vm1415_vm3, %v1412_v34  ;;  %v1411_v35 = vsel %vm1401_vm6, %v1399_v25, %v1540_v33 }
 0x504   :  { %1414 = vst.msk [vmem:[%s2962_s12] sm:$0xff] %vm1413_vm5, %v1411_v35 }

</bundles_post_ra>
